<compile_context>
chip_gen: v7x
topology: tpu7x:2x2x1
jax: 0.10.0
libtpu: 0.0.40
codegen_flags: <defaults>
</compile_context>

<pallas_src>
import jax
import jax.numpy as jnp
from jax.experimental import pallas as pl
from jax.experimental.pallas import tpu as pltpu

# ----- small, consistent model config (scaled-down MODEL_CONFIG) -----
BERT_HIDDEN = 64      # MODEL_CONFIG['bert_hidden']  (768 in the original)
BLOCK_SIZE = 16       # MODEL_CONFIG['block_size']   (64 in the original)
REP_HIDDEN = 32       # MODEL_CONFIG['hidden_size']  (256 in the original)

# ----- problem sizes -----
B = 2                 # batch
C = 16                # document length
E = 4                 # entity_lim
M = 3                 # mention_lim
P = 8                 # pair_num


def rank_kernel(head_ref, tail_ref, w_ref, b_ref, out_ref):
    """One block of pairs per grid step.

    head_ref / tail_ref : (block_n, H_pad) bf16 pooled + gathered pair reps
    w_ref               : (H_pad, H_pad)   bf16 block-diag folded weight (grid-resident)
    b_ref               : (1,)             f32  fused scalar bias (SMEM)
    out_ref             : (1, block_n)     f32  lane-dense score row
    """
    # MXU: one (block_n, H) x (H, H) bf16 matmul with f32 accumulation.
    tmp = jnp.dot(head_ref[...], w_ref[...], preferred_element_type=jnp.float32)
    # VPU multiply + cross-lane (XLU) reduce replaces the N=1 output matmul.
    score = jnp.sum(tmp * tail_ref[...].astype(jnp.float32), axis=-1)      # (block_n,)
    out_ref[...] = (score + b_ref[0])[None, :].astype(out_ref.dtype)


def _round_up(x, m):
    return ((x + m - 1) // m) * m


def search_rank_forward(embed_docu, word_pos, head_ids, tail_ids,
                        w_bilinear, b_bilinear, w_out, b_out,
                        *, block_n_target=512):
    """Full forward (post-BERT). Gathers + weight folding in JAX, scoring in Pallas."""
    batch, _, H = embed_docu.shape
    pair_num = head_ids.shape[1]
    bs = BLOCK_SIZE
    groups = H // bs
    n_pairs = batch * pair_num

    # --- glue: pool over mentions BEFORE the pair gather (max commutes with the gather) ---
    b_idx3 = jnp.arange(batch)[:, None, None]
    entity_rep = jnp.max(embed_docu[b_idx3, word_pos], axis=2)             # (B, E, H)
    b_idx2 = jnp.arange(batch)[:, None]
    head_flat = entity_rep[b_idx2, head_ids].reshape(n_pairs, H)           # (B*P, H)
    tail_flat = entity_rep[b_idx2, tail_ids].reshape(n_pairs, H)           # (B*P, H)

    # --- fold bilinear (H*bs -> R) and linear_out (R -> 1); no activation in between ---
    w_fused = (w_out @ w_bilinear)[0]                                      # (H*bs,)
    b_fused = (w_out @ b_bilinear + b_out).reshape(1).astype(jnp.float32)  # (1,)
    # Block-diagonal layout: Wbd[g*bs+i, g*bs+j] = w_fused[g*bs*bs + i*bs + j];
    # score[n] = head[n] @ Wbd @ tail[n] + b_fused  ==  rel[n] @ w_fused + b_fused.
    w3 = w_fused.reshape(groups, bs, bs)
    w_bd = (w3[:, :, None, :]
            * jnp.eye(groups, dtype=w3.dtype)[:, None, :, None]).reshape(H, H)

    # --- alignment padding: pair axis to a multiple of block_n (>=128), hidden to 128 lanes ---
    block_n = min(block_n_target, max(128, _round_up(n_pairs, 128)))
    n_padded = _round_up(n_pairs, block_n)
    h_pad = _round_up(H, 128)

    head_p = jnp.pad(head_flat, ((0, n_padded - n_pairs), (0, h_pad - H))).astype(jnp.bfloat16)
    tail_p = jnp.pad(tail_flat, ((0, n_padded - n_pairs), (0, h_pad - H))).astype(jnp.bfloat16)
    w_p = jnp.pad(w_bd, ((0, h_pad - H), (0, h_pad - H))).astype(jnp.bfloat16)

    out = pl.pallas_call(
        rank_kernel,
        out_shape=jax.ShapeDtypeStruct((1, n_padded), jnp.float32),
        grid=(n_padded // block_n,),
        in_specs=[
            pl.BlockSpec((block_n, h_pad), lambda i: (i, 0)),              # pipelined over pairs
            pl.BlockSpec((block_n, h_pad), lambda i: (i, 0)),
            pl.BlockSpec((h_pad, h_pad), lambda i: (0, 0)),                # weight: resident, DMA'd once
            pl.BlockSpec(memory_space=pltpu.MemorySpace.SMEM),             # scalar bias
        ],
        out_specs=pl.BlockSpec((1, block_n), lambda i: (0, i)),            # lane-dense output row
        compiler_params=pltpu.CompilerParams(
            dimension_semantics=("parallel",)),                            # v7x megacore over pairs
    )(head_p, tail_p, w_p, b_fused)

    # Drop alignment padding (garbage rows never reach the caller).
    return out[0, :n_pairs].reshape(batch, pair_num)                       # (B, P)


def reference_forward(embed_docu, word_pos, head_ids, tail_ids,
                      w_bilinear, b_bilinear, w_out, b_out):
    """Pure-JAX reference mirroring the PyTorch forward exactly (f32 end-to-end)."""
    batch = embed_docu.shape[0]
    H = embed_docu.shape[-1]
    pair_num = head_ids.shape[1]

    b_idx3 = jnp.arange(batch)[:, None, None]
    entity_rep = embed_docu[b_idx3, word_pos]                              # (B, E, M, H)
    entity_rep = jnp.max(entity_rep, axis=2)                               # (B, E, H)

    b_idx2 = jnp.arange(batch)[:, None]
    head_rep = entity_rep[b_idx2, head_ids]                                # (B, P, H)
    tail_rep = entity_rep[b_idx2, tail_ids]                                # (B, P, H)

    hr = head_rep.reshape(batch, pair_num, H // BLOCK_SIZE, BLOCK_SIZE)
    tr = tail_rep.reshape(batch, pair_num, H // BLOCK_SIZE, BLOCK_SIZE)
    rel = (hr[..., :, None] * tr[..., None, :]).reshape(batch, pair_num, H * BLOCK_SIZE)
    rep = rel @ w_bilinear.T + b_bilinear                                  # nn.Linear
    score = (rep @ w_out.T + b_out)[..., 0]
    return score


if __name__ == "__main__":
    key = jax.random.PRNGKey(0)
    k_doc, k_wp, k_h, k_t, k_wb, k_bb, k_wo, k_bo = jax.random.split(key, 8)

    # stand-in for BERT output (see TODO above)
    embed_docu = jax.random.normal(k_doc, (B, C, BERT_HIDDEN), dtype=jnp.float32)
    word_pos = jax.random.randint(k_wp, (B, E, M), 0, C, dtype=jnp.int32)
    head_ids = jax.random.randint(k_h, (B, P), 0, E, dtype=jnp.int32)
    tail_ids = jax.random.randint(k_t, (B, P), 0, E, dtype=jnp.int32)

    # deterministic parameter init (nn.Linear shapes: weight (out, in), bias (out,))
    fan_in_bil = BERT_HIDDEN * BLOCK_SIZE
    w_bilinear = jax.random.uniform(k_wb, (REP_HIDDEN, fan_in_bil), jnp.float32,
                                    -1.0, 1.0) / jnp.sqrt(fan_in_bil)
    b_bilinear = jax.random.uniform(k_bb, (REP_HIDDEN,), jnp.float32,
                                    -1.0, 1.0) / jnp.sqrt(fan_in_bil)
    w_out = jax.random.uniform(k_wo, (1, REP_HIDDEN), jnp.float32,
                               -1.0, 1.0) / jnp.sqrt(REP_HIDDEN)
    b_out = jax.random.uniform(k_bo, (1,), jnp.float32, -1.0, 1.0) / jnp.sqrt(REP_HIDDEN)

    score = search_rank_forward(embed_docu, word_pos, head_ids, tail_ids,
                                w_bilinear, b_bilinear, w_out, b_out)
    score = jax.block_until_ready(score)

    ref = reference_forward(embed_docu, word_pos, head_ids, tail_ids,
                            w_bilinear, b_bilinear, w_out, b_out)
    assert score.shape == (B, P)
    # bf16 inputs with f32 accumulation: loosen tolerance vs. the f32 reference.
    assert jnp.allclose(score, ref, atol=3e-2, rtol=3e-2), (score, ref)

    print("KERNEL_OK")
</pallas_src>

<mosaic_0001>
module attributes {stable_mosaic.version = 11 : i64} {
  func.func @rank_kernel(%arg0: i32, %arg1: memref<128x128xbf16, #tpu.memory_space<vmem>>, %arg2: memref<128x128xbf16, #tpu.memory_space<vmem>>, %arg3: memref<128x128xbf16, #tpu.memory_space<vmem>>, %arg4: memref<1xf32, #tpu.memory_space<smem>>, %arg5: memref<1x128xf32, #tpu.memory_space<vmem>>) attributes {dimension_semantics = [#tpu.dimension_semantics<parallel>], iteration_bounds = array<i64: 1>, scalar_prefetch = 0 : i64, scratch_operands = 0 : i64, tpu.core_type = #tpu.core_type<tc>, window_params = [{transform_indices = @transform_0, window_bounds = array<i64: 128, 128>}, {transform_indices = @transform_1, window_bounds = array<i64: 128, 128>}, {pipeline_mode = #tpu.pipeline_mode<synchronous>, transform_indices = @transform_2, window_bounds = array<i64: 128, 128>}, {transform_indices = @transform_3, window_bounds = array<i64: 1>}, {transform_indices = @transform_4, window_bounds = array<i64: 1, 128>}]} {
    %c0 = arith.constant 0 : index
    %c0_0 = arith.constant 0 : index
    %0 = vector.load %arg1[%c0, %c0_0] : memref<128x128xbf16, #tpu.memory_space<vmem>>, vector<128x128xbf16>
    %c0_1 = arith.constant 0 : index
    %c0_2 = arith.constant 0 : index
    %1 = vector.load %arg3[%c0_1, %c0_2] : memref<128x128xbf16, #tpu.memory_space<vmem>>, vector<128x128xbf16>
    %cst = arith.constant dense<0.000000e+00> : vector<128x128xf32>
    %2 = tpu.matmul %0, %1, %cst {dimension_numbers = #tpu.dot_dimension_numbers<[1], [0], [0], [1], [0, 0, 1, 1], [], []>} : vector<128x128xbf16>, vector<128x128xbf16>, vector<128x128xf32> -> vector<128x128xf32>
    %c0_3 = arith.constant 0 : index
    %c0_4 = arith.constant 0 : index
    %3 = vector.load %arg2[%c0_3, %c0_4] : memref<128x128xbf16, #tpu.memory_space<vmem>>, vector<128x128xbf16>
    %4 = arith.extf %3 : vector<128x128xbf16> to vector<128x128xf32>
    %5 = arith.mulf %2, %4 : vector<128x128xf32>
    %cst_5 = arith.constant dense<0.000000e+00> : vector<128xf32>
    %6 = vector.multi_reduction <add>, %5, %cst_5 [1] : vector<128x128xf32> to vector<128xf32>
    %c0_6 = arith.constant 0 : index
    %7 = memref.load %arg4[%c0_6] : memref<1xf32, #tpu.memory_space<smem>>
    %8 = vector.broadcast %7 : f32 to vector<128xf32>
    %9 = arith.addf %6, %8 : vector<128xf32>
    %10 = vector.shape_cast %9 : vector<128xf32> to vector<1x128xf32>
    %c0_7 = arith.constant 0 : index
    %c0_8 = arith.constant 0 : index
    %11 = vector.load %arg5[%c0_7, %c0_8] : memref<1x128xf32, #tpu.memory_space<vmem>>, vector<1x128xf32>
    tpu.vector_store %arg5[%c0_7, %c0_8], %10 {strides = array<i32>} : memref<1x128xf32, #tpu.memory_space<vmem>>, vector<1x128xf32>,
    return
  }
  func.func @transform_0(%arg0: i32) -> (i32, i32) {
    %c0_i32 = arith.constant 0 : i32
    %c0_i32_0 = arith.constant 0 : i32
    return %arg0, %c0_i32 : i32, i32
  }
  func.func @transform_1(%arg0: i32) -> (i32, i32) {
    %c0_i32 = arith.constant 0 : i32
    %c0_i32_0 = arith.constant 0 : i32
    return %arg0, %c0_i32 : i32, i32
  }
  func.func @transform_2(%arg0: i32) -> (i32, i32) {
    %c0_i32 = arith.constant 0 : i32
    %c0_i32_0 = arith.constant 0 : i32
    %c0_i32_1 = arith.constant 0 : i32
    return %c0_i32, %c0_i32_0 : i32, i32
  }
  func.func @transform_3(%arg0: i32) -> i32 {
    %c0_i32 = arith.constant 0 : i32
    %c0_i32_0 = arith.constant 0 : i32
    return %c0_i32 : i32
  }
  func.func @transform_4(%arg0: i32) -> (i32, i32) {
    %c0_i32 = arith.constant 0 : i32
    %c0_i32_0 = arith.constant 0 : i32
    return %c0_i32, %arg0 : i32, i32
  }
}

</mosaic_0001>

<bundles_post_ra>
// kernel: tpu_custom_call.1
= control target key start
LH: loop header
LB: loop body
LE: loop exit
PB: predicated region body
PF: predicated region fallthrough
CT: control target
= control target key end

     0   :  { %10 = vsyncpa [#allocation4], 0  ;;  %s929_s0 = inlined_call_operand.hbm [shape: bf16[128,128], index: 0, kind: input, shape index: {}]   ;;  %s930_s1 = inlined_call_operand.hbm [shape: bf16[128,128], index: 1, kind: input, shape index: {}]   ;;  %s931_s2 = inlined_call_operand.hbm [shape: bf16[128,128], index: 2, kind: input, shape index: {}]   ;;  %s932_s3 = inlined_call_operand.<no memory space> [shape: f32[1], index: 3, kind: input, shape index: {}]   ;;  %s933_s4 = inlined_call_operand.hbm [shape: f32[1,128], index: 4, kind: output, shape index: {}]  }
   0x1   :  { %11 = vsyncpa [#allocation7], 0 }
   0x2   :  { %12 = vsyncpa [#allocation5], 0  ;;  %s764_s15 = smov [#allocation6]   ;;  %s765_s17 = smov [#allocation3]  }
   0x3   :  { %s30_s16 = sshll.u32 %s764_s15, 4  ;;  %s18_s18 = sshll.u32 %s765_s17, 4  ;;  %s31_s16 = int_to_ptr.vmem [resolvable:$true] %s30_s16  ;;  %s795_s18 = int_to_ptr.vmem [resolvable:$true] %s18_s18 }
   0x4   :  { %s670_s21 = scalar_lea.hbm %s930_s1, 1024 }
   0x5   :  { %p671_p0 = scmp.ne.s32.totalorder %s930_s1, %s670_s21  ;;  %p674_p1 = scmp.lt.u32.totalorder %s670_s21, %s930_s1 }
   0x7   :  { %p676_p2 = pnand %p674_p1, %p671_p0 }
   0x9   :  { %679 = shalt.err (!%p676_p2)
}
   0xa   :  { %s680_s26 = scalar_lea.vmem %s31_s16, 1024  ;;  %p685_p4 = scmp.lt.s32.totalorder %s31_s16, %s31_s16 }
   0xb   :  { %p681_p3 = scmp.ne.s32.totalorder %s31_s16, %s680_s26  ;;  %p686_p5 = scmp.lt.s32.totalorder %s680_s26, %s680_s26 }
   0xd   :  { %p687_p6 = por %p686_p5, %p685_p4 }
   0xf   :  { %p688_p7 = pnand %p687_p6, %p681_p3 }
  0x11   :  { %691 = shalt.err (!%p688_p7)
}
  0x12   :  { %s766_s27 = smov 64   ;;  %s767_s28 = smov 4  }
  0x13   :  { %36 = dma.hbm_to_vmem [thread:$0]  %s930_s1, 1024, %s31_s16, [#allocation7], %s766_s27, %s766_s27, %s767_s28  }
  0x14   :  { %s692_s7 = scalar_lea.hbm %s929_s0, 1024 }
  0x15   :  { %p693_p8 = scmp.ne.s32.totalorder %s929_s0, %s692_s7  ;;  %p696_p9 = scmp.lt.u32.totalorder %s692_s7, %s929_s0 }
  0x17   :  { %p698_p10 = pnand %p696_p9, %p693_p8 }
  0x19   :  { %701 = shalt.err (!%p698_p10)
}
  0x1a   :  { %s702_s12 = scalar_lea.vmem %s795_s18, 1024  ;;  %p707_p12 = scmp.lt.s32.totalorder %s795_s18, %s795_s18 }
  0x1b   :  { %p703_p11 = scmp.ne.s32.totalorder %s795_s18, %s702_s12  ;;  %p708_p13 = scmp.lt.s32.totalorder %s702_s12, %s702_s12 }
  0x1d   :  { %p709_p0 = por %p708_p13, %p707_p12 }
  0x1f   :  { %p710_p1 = pnand %p709_p0, %p703_p11 }
  0x21   :  { %713 = shalt.err (!%p710_p1)
}
  0x22   :  { %24 = dma.hbm_to_vmem [thread:$0]  %s929_s0, 1024, %s795_s18, [#allocation4], %s766_s27, %s766_s27, %s767_s28  }
  0x23   :  { %s768_s14 = smov [#allocation8]   ;;  %s714_s19 = scalar_lea.hbm %s931_s2, 1024 }
  0x24   :  { %s42_s15 = sshll.u32 %s768_s14, 4  ;;  %p715_p2 = scmp.ne.s32.totalorder %s931_s2, %s714_s19  ;;  %s43_s15 = int_to_ptr.vmem [resolvable:$true] %s42_s15 }
  0x25   :  { %p718_p3 = scmp.lt.u32.totalorder %s714_s19, %s931_s2 }
  0x27   :  { %p720_p4 = pnand %p718_p3, %p715_p2 }
  0x29   :  { %723 = shalt.err (!%p720_p4)
}
  0x2a   :  { %s724_s24 = scalar_lea.vmem %s43_s15, 1024  ;;  %p729_p6 = scmp.lt.s32.totalorder %s43_s15, %s43_s15 }
  0x2b   :  { %p725_p5 = scmp.ne.s32.totalorder %s43_s15, %s724_s24  ;;  %p730_p7 = scmp.lt.s32.totalorder %s724_s24, %s724_s24 }
  0x2d   :  { %p731_p8 = por %p730_p7, %p729_p6 }
  0x2f   :  { %p732_p9 = pnand %p731_p8, %p725_p5 }
  0x31   :  { %735 = shalt.err (!%p732_p9)
}
  0x32   :  { %48 = dma.hbm_to_vmem [thread:$0]  %s931_s2, 1024, %s43_s15, [#allocation7], %s766_s27, %s766_s27, %s767_s28  }
  0x33   :  { %758 = dma.done.wait [#allocation4], 1024  }
  0x34   :  { %759 = vsyncadd [#allocation4], 4294966272 }
  0x35   :  { %760 = dma.done.wait [#allocation7], 2048  }
  0x36   :  { %761 = vsyncadd [#allocation7], 4294965248  ;;  %v654_v0 = vld [vmem:[#allocation8] sm:$0xff]   ;;  %v655_v1 = vld [vmem:[#allocation8 + $0x8] sm:$0xff]   ;;  %vm411_vm0 = vcmask 130112   ;;  %vm418_vm1 = vcmask 195712  }
  0x37   :  { %600 = vmatprep.subr.bf16.mxu0 %v654_v0  ;;  %632 = vmatprep.subr.bf16.mxu1 %v654_v0  ;;  %v656_v2 = vld [vmem:[#allocation8 + $0x10] sm:$0xff]   ;;  %v657_v3 = vld [vmem:[#allocation8 + $0x18] sm:$0xff]   ;;  %v662_v4 = vld [vmem:[#allocation3] sm:$0xff]   ;;  %vm425_vm2 = vcmask 261312   ;;  %vm432_vm3 = vcmask 326912   ;;  %vm439_vm4 = vcmask 392512  }
  0x38   :  { %601 = vmatpush3.bf16.msra.mxu0 %v654_v0  ;;  %640 = vmatpush3.bf16.msra.mxu1 %v654_v0  ;;  %v664_v5 = vld [vmem:[#allocation3 + $0x20] sm:$0xff]   ;;  %v659_v7 = vld [vmem:[#allocation8 + $0x28] sm:$0xff]   ;;  %v660_v8 = vld [vmem:[#allocation8 + $0x30] sm:$0xff]   ;;  %vm446_vm5 = vcmask 458112   ;;  %vm453_vm6 = vcmask 523712   ;;  %vm460_vm7 = vcmask 589312  }
  0x39   :  { %602 = vmatprep.subr.bf16.mxu0 %v655_v1  ;;  %633 = vmatprep.subr.bf16.mxu1 %v655_v1  ;;  %v658_v6 = vld [vmem:[#allocation8 + $0x20] sm:$0xff]   ;;  %v661_v9 = vld [vmem:[#allocation8 + $0x38] sm:$0xff]   ;;  %v663_v10 = vld [vmem:[#allocation3 + $0x8] sm:$0xff]   ;;  %vm467_vm8 = vcmask 654912   ;;  %vm474_vm9 = vcmask 720512   ;;  %vm481_vm10 = vcmask 786112  }
  0x3a   :  { %616 = vmatprep.mubr.bf16.mxu0 %v662_v4  ;;  %624 = vmatprep.mubr.bf16.mxu1 %v664_v5  ;;  %v665_v11 = vld [vmem:[#allocation3 + $0x28] sm:$0xff]   ;;  %v666_v12 = vld [vmem:[#allocation3 + $0x10] sm:$0xff]   ;;  %v667_v14 = vld [vmem:[#allocation3 + $0x18] sm:$0xff]   ;;  %vm488_vm11 = vcmask 851712   ;;  %vm495_vm12 = vcmask 917312   ;;  %vm502_vm13 = vcmask 982912  }
  0x3b   :  { %v668_v13 = vld [vmem:[#allocation3 + $0x30] sm:$0xff]   ;;  %v669_v15 = vld [vmem:[#allocation3 + $0x38] sm:$0xff]   ;;  %v577_v16 = vld [vmem:[#allocation6 + $0x8] sm:$0xff]   ;;  %vm509_vm14 = vcmask 1048512  }
  0x3c   :  { %603 = vmatpush3.bf16.msra.mxu0 %v655_v1  ;;  %641 = vmatpush3.bf16.msra.mxu1 %v655_v1  ;;  %v546_v17 = vld [vmem:[#allocation6] sm:$0xff]   ;;  %v551_v19 = vunpack.c.l.bf16 %v577_v16  ;;  %v552_v25 = vunpack.c.h.bf16 %v577_v16  ;;  %v579_v34 = vld [vmem:[#allocation6 + $0x18] sm:$0xff]   ;;  %v578_v46 = vld [vmem:[#allocation6 + $0x10] sm:$0xff]   ;;  %v855_v16 = vstv %s932_s3  ;;  %s769_s3 = smov [#allocation9]  }
  0x3d   :  { %604 = vmatprep.subr.bf16.mxu0 %v656_v2  ;;  %634 = vmatprep.subr.bf16.mxu1 %v656_v2  ;;  %v580_v18 = vld [vmem:[#allocation6 + $0x20] sm:$0xff]   ;;  %v547_v20 = vunpack.c.l.bf16 %v546_v17  ;;  %v548_v37 = vunpack.c.h.bf16 %v546_v17  ;;  %v560_v38 = vunpack.c.h.bf16 %v579_v34  ;;  %v559_v40 = vunpack.c.l.bf16 %v579_v34  ;;  %v581_v54 = vld [vmem:[#allocation6 + $0x28] sm:$0xff]   ;;  %v582_v56 = vld [vmem:[#allocation6 + $0x30] sm:$0xff]   ;;  %s519_s26 = sshll.u32 %s769_s3, 4  ;;  %s520_s26 = int_to_ptr.vmem [resolvable:$true] %s519_s26 }
  0x3e   :  { %v563_v23 = vunpack.c.l.bf16 %v580_v18  ;;  %v564_v36 = vunpack.c.h.bf16 %v580_v18  ;;  %v556_v53 = vunpack.c.h.bf16 %v578_v46  ;;  %v555_v55 = vunpack.c.l.bf16 %v578_v46  ;;  %v583_v0 = vld [vmem:[#allocation6 + $0x38] sm:$0xff]   ;;  %s736_s27 = scalar_lea.vmem %s520_s26, 16  ;;  %s740_s28 = scalar_lea.vmem %s520_s26, 32 }
  0x3f   :  { %v568_v57 = vunpack.c.h.bf16 %v581_v54  ;;  %v567_v59 = vunpack.c.l.bf16 %v581_v54  ;;  %v572_v61 = vunpack.c.h.bf16 %v582_v56  ;;  %v571_v1 = vunpack.c.l.bf16 %v582_v56  ;;  %p737_p10 = scmp.ne.s32.totalorder %s520_s26, %s736_s27  ;;  %p741_p11 = scmp.lt.s32.totalorder %s520_s26, %s520_s26 }
  0x40   :  { %605 = vmatpush3.bf16.msra.mxu0 %v656_v2  ;;  %642 = vmatpush3.bf16.msra.mxu1 %v656_v2  ;;  %v575_v4 = vunpack.c.l.bf16 %v583_v0  ;;  %p742_p12 = scmp.lt.s32.totalorder %s740_s28, %s736_s27 }
  0x41   :  { %606 = vmatprep.subr.bf16.mxu0 %v657_v3  ;;  %635 = vmatprep.subr.bf16.mxu1 %v657_v3 }
  0x42   :  { %p743_p13 = por %p742_p12, %p741_p11 }
  0x44   :  { %607 = vmatpush3.bf16.msra.mxu0 %v657_v3  ;;  %643 = vmatpush3.bf16.msra.mxu1 %v657_v3  ;;  %v576_v3 = vunpack.c.h.bf16 %v583_v0  ;;  %p744_p0 = pnand %p743_p13, %p737_p10 }
  0x45   :  { %608 = vmatprep.subr.bf16.mxu0 %v658_v6  ;;  %636 = vmatprep.subr.bf16.mxu1 %v658_v6 }
  0x48   :  { %609 = vmatpush3.bf16.msra.mxu0 %v658_v6  ;;  %644 = vmatpush3.bf16.msra.mxu1 %v658_v6 }
  0x49   :  { %610 = vmatprep.subr.bf16.mxu0 %v659_v7  ;;  %637 = vmatprep.subr.bf16.mxu1 %v659_v7 }
  0x4c   :  { %611 = vmatpush3.bf16.msra.mxu0 %v659_v7  ;;  %645 = vmatpush3.bf16.msra.mxu1 %v659_v7 }
  0x4d   :  { %612 = vmatprep.subr.bf16.mxu0 %v660_v8  ;;  %638 = vmatprep.subr.bf16.mxu1 %v660_v8 }
  0x50   :  { %613 = vmatpush3.bf16.msra.mxu0 %v660_v8  ;;  %646 = vmatpush3.bf16.msra.mxu1 %v660_v8  ;;  %v400_v8 = vlaneseq }
  0x51   :  { %614 = vmatprep.subr.bf16.mxu0 %v661_v9  ;;  %639 = vmatprep.subr.bf16.mxu1 %v661_v9 }
  0x54   :  { %615 = vmatpush3.bf16.msra.mxu0 %v661_v9  ;;  %647 = vmatpush3.bf16.msra.mxu1 %v661_v9 }
  0x57   :  { %617 = vmatmul.mubr.bf16.vlgmr.msra.gmra.mrb[0].mxu0 %v663_v10  ;;  %625 = vmatmul.mubr.bf16.vlgmr.msra.gmra.mrb[0].mxu1 %v665_v11  ;;  %v847_v11 = vand.u32 127, %v400_v8 }
  0x58   :  { %620 = vmatprep.mubr.bf16.mxu0 %v666_v12  ;;  %628 = vmatprep.mubr.bf16.mxu1 %v668_v13 }
  0x59   :  { %v406_v13 = vadd.s32 4294967288, %v847_v11  ;;  %v413_v17 = vadd.s32 4294967280, %v847_v11  ;;  %v427_v34 = vadd.s32 4294967264, %v847_v11 }
  0x5f   :  { %621 = vmatmul.mubr.bf16.gmra.mrb[4].mxu0 %v667_v14  ;;  %629 = vmatmul.mubr.bf16.gmra.mrb[4].mxu1 %v669_v15  ;;  %v850_v14 = vshrl.u32 %v400_v8, 7 }
 0x12a   :  { %v618_v21 = vpop.f32.mrb[0].mxu0  ;;  %v626_v22 = vpop.f32.mrb[0].mxu1 }
 0x12b   :  { %v223_v24 = vpop.f32.mrb[1].mxu0  ;;  %v255_v26 = vpop.f32.mrb[1].mxu1  ;;  %v320_v27 = vmul.f32 %v618_v21, %v551_v19  ;;  %v328_v63 = vmul.f32 %v626_v22, %v567_v59  ;;  %v409_v19 = vsub.s32 %v406_v13, %v850_v14  ;;  %v420_v22 = vadd.s32 4294967272, %v847_v11 }
 0x12c   :  { %v619_v28 = vpop.f32.mrb[2].mxu0  ;;  %v627_v29 = vpop.f32.mrb[2].mxu1  ;;  %v318_v30 = vmul.f32 %v547_v20, %v223_v24  ;;  %v326_v33 = vmul.f32 %v563_v23, %v255_v26  ;;  %v404_v20 = vsub.s32 %v847_v11, %v850_v14  ;;  %v455_v23 = vadd.s32 4294967232, %v847_v11 }
 0x12d   :  { %338 = vadd.xlane.f32.xlu1 %v320_v27  ;;  %v226_v31 = vpop.f32.mrb[3].mxu0  ;;  %v258_v32 = vpop.f32.mrb[3].mxu1  ;;  %v321_v35 = vmul.f32 %v619_v28, %v552_v25  ;;  %v329_v62 = vmul.f32 %v627_v29, %v568_v57  ;;  %v865_v25 = vadd.s32 4294967224, %v847_v11  ;;  %v448_v27 = vadd.s32 4294967240, %v847_v11 }
 0x12e   :  { %334 = vadd.xlane.f32.xlu0 %v318_v30  ;;  %v327_v42 = vmul.f32 %v564_v36, %v258_v32  ;;  %v319_v45 = vmul.f32 %v548_v37, %v226_v31  ;;  %v416_v28 = vsub.s32 %v413_v17, %v850_v14  ;;  %v441_v29 = vadd.s32 4294967248, %v847_v11 }
 0x12f   :  { %v423_v36 = vsub.s32 %v420_v22, %v850_v14  ;;  %v458_v37 = vsub.s32 %v455_v23, %v850_v14  ;;  %v490_v59 = vadd.s32 4294967192, %v847_v11  ;;  %v497_v17 = vadd.s32 4294967184, %v847_v11 }
 0x130   :  { %v504_v22 = vadd.s32 4294967176, %v847_v11 }
 0x131   :  { %340 = vadd.xlane.f32.xlu1 %v321_v35 }
 0x132   :  { %350 = vadd.xlane.f32.xlu0 %v326_v33  ;;  %v622_v39 = vpop.f32.mrb[4].mxu0  ;;  %v630_v41 = vpop.f32.mrb[4].mxu1  ;;  %v434_v33 = vadd.s32 4294967256, %v847_v11 }
 0x133   :  { %v239_v43 = vpop.f32.mrb[5].mxu0  ;;  %v271_v44 = vpop.f32.mrb[5].mxu1  ;;  %v324_v52 = vmul.f32 %v622_v39, %v559_v40  ;;  %v332_v7 = vmul.f32 %v630_v41, %v575_v4  ;;  %v465_v39 = vsub.s32 %v865_v25, %v850_v14  ;;  %v451_v40 = vsub.s32 %v448_v27, %v850_v14 }
 0x134   :  { %v623_v47 = vpop.f32.mrb[6].mxu0  ;;  %v631_v48 = vpop.f32.mrb[6].mxu1  ;;  %v322_v60 = vmul.f32 %v555_v55, %v239_v43  ;;  %v330_v5 = vmul.f32 %v571_v1, %v271_v44  ;;  %v476_v41 = vadd.s32 4294967208, %v847_v11  ;;  %v444_v44 = vsub.s32 %v441_v29, %v850_v14 }
 0x135   :  { %352 = vadd.xlane.f32.xlu1 %v327_v42  ;;  %v325_v49 = vmul.f32 %v623_v47, %v560_v38  ;;  %v242_v50 = vpop.f32.mrb[7].mxu0  ;;  %v274_v51 = vpop.f32.mrb[7].mxu1  ;;  %v333_v6 = vmul.f32 %v631_v48, %v576_v3  ;;  %v437_v47 = vsub.s32 %v434_v33, %v850_v14 }
 0x136   :  { %336 = vadd.xlane.f32.xlu0 %v319_v45  ;;  %v323_v58 = vmul.f32 %v556_v53, %v242_v50  ;;  %v331_v2 = vmul.f32 %v572_v61, %v274_v51  ;;  %v469_v45 = vadd.s32 4294967216, %v847_v11  ;;  %v479_v55 = vsub.s32 %v476_v41, %v850_v14 }
 0x139   :  { %348 = vadd.xlane.f32.xlu1 %v325_v49  ;;  %v430_v49 = vsub.s32 %v427_v34, %v850_v14 }
 0x13a   :  { %346 = vadd.xlane.f32.xlu0 %v324_v52 }
 0x13d   :  { %344 = vadd.xlane.f32.xlu1 %v323_v58  ;;  %v472_v58 = vsub.s32 %v469_v45, %v850_v14 }
 0x13e   :  { %342 = vadd.xlane.f32.xlu0 %v322_v60 }
 0x141   :  { %356 = vadd.xlane.f32.xlu1 %v329_v62 }
 0x142   :  { %354 = vadd.xlane.f32.xlu0 %v328_v63  ;;  %v483_v63 = vadd.s32 4294967200, %v847_v11  ;;  %v507_v11 = vsub.s32 %v504_v22, %v850_v14 }
 0x145   :  { %360 = vadd.xlane.f32.xlu1 %v331_v2 }
 0x146   :  { %358 = vadd.xlane.f32.xlu0 %v330_v5 }
 0x149   :  { %364 = vadd.xlane.f32.xlu1 %v333_v6 }
 0x14a   :  { %362 = vadd.xlane.f32.xlu0 %v332_v7 }
 0x1ba   :  { %v339_v9 = vpop.xlane.xlu1 %338 }
 0x1bb   :  { %v335_v10 = vpop.xlane.xlu0 %334  ;;  %v370_v30 = vadd.f32 %v855_v16, %v339_v9 }
 0x1bc   :  { %v368_v21 = vadd.f32 %v855_v16, %v335_v10 }
 0x1bd   :  { %v417_v46 = vrot.slane %v370_v30, %v416_v28 }
 0x1be   :  { %v341_v12 = vpop.xlane.xlu1 %340  ;;  %v405_v35 = vrot.slane %v368_v21, %v404_v20  ;;  %v493_v20 = vsub.s32 %v490_v59, %v850_v14 }
 0x1bf   :  { %v351_v15 = vpop.xlane.xlu0 %350  ;;  %v371_v42 = vadd.f32 %v855_v16, %v341_v12 }
 0x1c0   :  { %v376_v60 = vadd.f32 %v855_v16, %v351_v15  ;;  %v486_v15 = vsub.s32 %v483_v63, %v850_v14 }
 0x1c1   :  { %v424_v56 = vrot.slane %v371_v42, %v423_v36 }
 0x1c2   :  { %v353_v18 = vpop.xlane.xlu1 %352  ;;  %v459_v10 = vrot.slane %v376_v60, %v458_v37 }
 0x1c3   :  { %v337_v24 = vpop.xlane.xlu0 %336  ;;  %v377_v0 = vadd.f32 %v855_v16, %v353_v18 }
 0x1c4   :  { %v369_v26 = vadd.f32 %v855_v16, %v337_v24 }
 0x1c5   :  { %v466_v18 = vrot.slane %v377_v0, %v465_v39 }
 0x1c6   :  { %v410_v31 = vrot.slane %v369_v26, %v409_v19  ;;  %v349_v32 = vpop.xlane.xlu1 %348 }
 0x1c7   :  { %v347_v38 = vpop.xlane.xlu0 %346  ;;  %v375_v57 = vadd.f32 %v855_v16, %v349_v32  ;;  %v500_v32 = vsub.s32 %v497_v17, %v850_v14 }
 0x1c8   :  { %v412_v43 = vsel %vm411_vm0, %v410_v31, %v405_v35  ;;  %v374_v53 = vadd.f32 %v855_v16, %v347_v38 }
 0x1c9   :  { %v419_v52 = vsel %vm418_vm1, %v417_v46, %v412_v43  ;;  %v452_v7 = vrot.slane %v375_v57, %v451_v40 }
 0x1ca   :  { %v345_v48 = vpop.xlane.xlu1 %344  ;;  %v426_v2 = vsel %vm425_vm2, %v424_v56, %v419_v52  ;;  %v445_v4 = vrot.slane %v374_v53, %v444_v44 }
 0x1cb   :  { %v373_v50 = vadd.f32 %v855_v16, %v345_v48  ;;  %v343_v51 = vpop.xlane.xlu0 %342 }
 0x1cc   :  { %v372_v54 = vadd.f32 %v855_v16, %v343_v51 }
 0x1cd   :  { %v438_v1 = vrot.slane %v373_v50, %v437_v47 }
 0x1ce   :  { %v431_v61 = vrot.slane %v372_v54, %v430_v49  ;;  %v357_v62 = vpop.xlane.xlu1 %356 }
 0x1cf   :  { %v355_v3 = vpop.xlane.xlu0 %354  ;;  %v379_v9 = vadd.f32 %v855_v16, %v357_v62 }
 0x1d0   :  { %v433_v5 = vsel %vm432_vm3, %v431_v61, %v426_v2  ;;  %v378_v6 = vadd.f32 %v855_v16, %v355_v3 }
 0x1d1   :  { %v440_v8 = vsel %vm439_vm4, %v438_v1, %v433_v5  ;;  %v480_v26 = vrot.slane %v379_v9, %v479_v55 }
 0x1d2   :  { %v447_v12 = vsel %vm446_vm5, %v445_v4, %v440_v8  ;;  %v361_v13 = vpop.xlane.xlu1 %360  ;;  %v473_v24 = vrot.slane %v378_v6, %v472_v58 }
 0x1d3   :  { %v454_v19 = vsel %vm453_vm6, %v452_v7, %v447_v12  ;;  %v359_v21 = vpop.xlane.xlu0 %358  ;;  %v381_v28 = vadd.f32 %v855_v16, %v361_v13 }
 0x1d4   :  { %v461_v23 = vsel %vm460_vm7, %v459_v10, %v454_v19  ;;  %v380_v25 = vadd.f32 %v855_v16, %v359_v21 }
 0x1d5   :  { %v468_v27 = vsel %vm467_vm8, %v466_v18, %v461_v23  ;;  %v494_v38 = vrot.slane %v381_v28, %v493_v20 }
 0x1d6   :  { %v475_v29 = vsel %vm474_vm9, %v473_v24, %v468_v27  ;;  %v487_v30 = vrot.slane %v380_v25, %v486_v15  ;;  %v365_v31 = vpop.xlane.xlu1 %364 }
 0x1d7   :  { %v482_v33 = vsel %vm481_vm10, %v480_v26, %v475_v29  ;;  %v383_v34 = vadd.f32 %v855_v16, %v365_v31  ;;  %v363_v35 = vpop.xlane.xlu0 %362 }
 0x1d8   :  { %v489_v36 = vsel %vm488_vm11, %v487_v30, %v482_v33  ;;  %v382_v37 = vadd.f32 %v855_v16, %v363_v35 }
 0x1d9   :  { %v508_v40 = vrot.slane %v383_v34, %v507_v11  ;;  %v496_v41 = vsel %vm495_vm12, %v494_v38, %v489_v36 }
 0x1da   :  { %v501_v39 = vrot.slane %v382_v37, %v500_v32 }
 0x1dc   :  { %v503_v42 = vsel %vm502_vm13, %v501_v39, %v496_v41 }
 0x1dd   :  { %v510_v43 = vsel %vm509_vm14, %v508_v40, %v503_v42 }
 0x1de   :  { %512 = vst [vmem:[#allocation9] sm:$0x1] %v510_v43 }
 0x1df   :  { %747 = shalt.err (!%p744_p0)
}
 0x1e0   :  { %s748_s5 = scalar_lea.hbm %s933_s4, 16 }
 0x1e1   :  { %p749_p1 = scmp.ne.s32.totalorder %s933_s4, %s748_s5  ;;  %p752_p2 = scmp.lt.u32.totalorder %s748_s5, %s933_s4 }
 0x1e3   :  { %p754_p3 = pnand %p752_p2, %p749_p1 }
 0x1e5   :  { %757 = shalt.err (!%p754_p3)
}
 0x1e6   :  { %522 = dma.vmem_to_hbm [thread:$0]  %s520_s26, 16, %s933_s4, [#allocation5]  }
 0x1e7   :  { %762 = dma.done.wait [#allocation5], 16  }
 0x1e8   :  { %763 = vsyncadd [#allocation5], 4294967280 }
 0x1e9   :  { %526 = vsyncpa [#allocation4], 1 }
 0x1ea   :  { %527 = vsyncpa [#allocation7], 1 }
 0x1eb   :  { %528 = vsyncpa [#allocation5], 1 }

</bundles_post_ra>
